<compile_context>
chip_gen: v5e
topology: v5e:2x2
jax: 0.10.0
libtpu: 0.0.40
codegen_flags: <defaults>
</compile_context>

<pallas_src>
import jax
import jax.numpy as jnp
from jax.experimental import pallas as pl
from jax.experimental.pallas import tpu as pltpu

INPUT_SIZE = 4
HIDDEN_SIZE = 16
OUTPUT_SIZE = 2


def _round_up(n, m):
    return ((n + m - 1) // m) * m


def _mlp_kernel(w1_ref, b1_ref, w2t_ref, b2_ref, x_ref, o_ref):
    # w1_ref : (HIDDEN, INPUT)   -- torch fc1.weight layout
    # b1_ref : (HIDDEN, 1)
    # w2t_ref: (HIDDEN, OUTPUT)  -- torch fc2.weight transposed
    # b2_ref : (OUTPUT, 1)
    # x_ref  : (INPUT, TILE_B)   -- lane-dense activations (batch on lanes)
    # o_ref  : (OUTPUT, TILE_B)
    x = x_ref[...]        # (IN, TB) f32
    w1 = w1_ref[...]      # (HID, IN)
    w2t = w2t_ref[...]    # (HID, OUT)
    b2 = b2_ref[...]      # (OUT, 1)

    # fc1 + ReLU: h[j, n] = sum_i w1[j, i] * x[i, n] + b1[j]
    # INPUT_SIZE broadcast FMAs over full (HID, TILE_B) slabs — pure VPU.
    h = w1[:, 0:1] * x[0:1, :]
    for i in range(1, INPUT_SIZE):
        h = h + w1[:, i:i + 1] * x[i:i + 1, :]
    h = jnp.maximum(h + b1_ref[...], 0.0)                       # (HID, TB)

    # fc2: out[k, n] = sum_j w2[k, j] * h[j, n] + b2[k]
    # Per output row: weight-scaled copy of h (VPU), reduced across the 16
    # sublanes (XLU — separate issue slot, effectively free next to the VPU
    # work).  Rows are written directly into the lane-dense output block.
    for k in range(OUTPUT_SIZE):
        col = jnp.sum(w2t[:, k:k + 1] * h, axis=0, keepdims=True)   # (1, TB)
        o_ref[k:k + 1, :] = (col + b2[k:k + 1, :]).astype(o_ref.dtype)


def fault_detection_net(x, w1, b1, w2, b2, *, tile_b=4096):
    """x: (B, INPUT_SIZE) f32.
       w1: (HIDDEN, INPUT), b1: (HIDDEN,), w2: (OUTPUT, HIDDEN), b2: (OUTPUT,)
       (torch nn.Linear weight convention).  Returns (B, OUTPUT_SIZE) f32."""
    B = x.shape[0]

    # Lane-dense layout: features on sublanes, batch on lanes.  The wrapper
    # transpose is pure layout plumbing so the kernel sees lane-dense slabs.
    xt = x.astype(jnp.float32).T                   # (IN, B)

    # Batch tile: multiple of 128 lanes, no bigger than the padded batch.
    # Large tiles keep each grid step well above the ~0.35us step overhead;
    # VMEM use stays tiny (few MB even at 4096 lanes, double-buffered).
    tile_b = min(tile_b, _round_up(max(B, 1), 128))
    tile_b = _round_up(tile_b, 128)
    b_pad = _round_up(max(B, 1), tile_b)
    if b_pad != B:
        xt = jnp.pad(xt, ((0, 0), (0, b_pad - B)))

    w2t = w2.astype(jnp.float32).T                 # (HID, OUT)
    b1c = b1.astype(jnp.float32).reshape(HIDDEN_SIZE, 1)
    b2c = b2.astype(jnp.float32).reshape(OUTPUT_SIZE, 1)

    grid = (b_pad // tile_b,)
    const = lambda i: (0, 0)                       # weights/biases stay resident

    out_t = pl.pallas_call(
        _mlp_kernel,
        out_shape=jax.ShapeDtypeStruct((OUTPUT_SIZE, b_pad), jnp.float32),
        grid=grid,
        in_specs=[
            pl.BlockSpec((HIDDEN_SIZE, INPUT_SIZE), const),
            pl.BlockSpec((HIDDEN_SIZE, 1), const),
            pl.BlockSpec((HIDDEN_SIZE, OUTPUT_SIZE), const),
            pl.BlockSpec((OUTPUT_SIZE, 1), const),
            pl.BlockSpec((INPUT_SIZE, tile_b), lambda i: (0, i)),
        ],
        out_specs=pl.BlockSpec((OUTPUT_SIZE, tile_b), lambda i: (0, i)),
        compiler_params=pltpu.CompilerParams(
            dimension_semantics=("parallel",),      # shard batch over TCs (v7x)
            vmem_limit_bytes=32 * 1024 * 1024,      # safe on v7x's 64 MiB VMEM
        ),
    )(w1.astype(jnp.float32), b1c, w2t, b2c, xt)

    return out_t[:, :B].T                           # back to (B, OUT)


def init_params(key):
    """nn.Linear-style init: U(-1/sqrt(fan_in), 1/sqrt(fan_in)), torch layouts."""
    k1, k2, k3, k4 = jax.random.split(key, 4)
    bound1 = 1.0 / (INPUT_SIZE ** 0.5)
    bound2 = 1.0 / (HIDDEN_SIZE ** 0.5)
    w1 = jax.random.uniform(k1, (HIDDEN_SIZE, INPUT_SIZE), jnp.float32, -bound1, bound1)
    b1 = jax.random.uniform(k2, (HIDDEN_SIZE,), jnp.float32, -bound1, bound1)
    w2 = jax.random.uniform(k3, (OUTPUT_SIZE, HIDDEN_SIZE), jnp.float32, -bound2, bound2)
    b2 = jax.random.uniform(k4, (OUTPUT_SIZE,), jnp.float32, -bound2, bound2)
    return w1, b1, w2, b2


def _reference(x, w1, b1, w2, b2):
    return jnp.maximum(x @ w1.T + b1, 0.0) @ w2.T + b2


if __name__ == "__main__":
    key = jax.random.PRNGKey(0)
    k_x, k_x2, k_p = jax.random.split(key, 3)
    w1, b1, w2, b2 = init_params(k_p)

    # Small batch (single tile, padded to 128 lanes).
    batch = 8
    x = jax.random.normal(k_x, (batch, INPUT_SIZE), jnp.float32)
    out = jax.block_until_ready(fault_detection_net(x, w1, b1, w2, b2))
    ref = _reference(x, w1, b1, w2, b2)
    assert out.shape == (batch, OUTPUT_SIZE)
    assert jnp.allclose(out, ref, atol=1e-5, rtol=1e-5)

    # Multi-tile path (grid=(2,), exercises batch tiling + padding slice-off).
    batch2 = 300
    x2 = jax.random.normal(k_x2, (batch2, INPUT_SIZE), jnp.float32)
    out2 = jax.block_until_ready(fault_detection_net(x2, w1, b1, w2, b2, tile_b=256))
    ref2 = _reference(x2, w1, b1, w2, b2)
    assert out2.shape == (batch2, OUTPUT_SIZE)
    assert jnp.allclose(out2, ref2, atol=1e-5, rtol=1e-5)

    print("KERNEL_OK")
</pallas_src>

<mosaic_0001>
module attributes {stable_mosaic.version = 11 : i64} {
  func.func @_mlp_kernel(%arg0: i32, %arg1: memref<16x4xf32, #tpu.memory_space<vmem>>, %arg2: memref<16x1xf32, #tpu.memory_space<vmem>>, %arg3: memref<16x2xf32, #tpu.memory_space<vmem>>, %arg4: memref<2x1xf32, #tpu.memory_space<vmem>>, %arg5: memref<4x128xf32, #tpu.memory_space<vmem>>, %arg6: memref<2x128xf32, #tpu.memory_space<vmem>>) attributes {dimension_semantics = [#tpu.dimension_semantics<parallel>], iteration_bounds = array<i64: 1>, scalar_prefetch = 0 : i64, scratch_operands = 0 : i64, tpu.core_type = #tpu.core_type<tc>, window_params = [{pipeline_mode = #tpu.pipeline_mode<synchronous>, transform_indices = @transform_0, window_bounds = array<i64: 16, 4>}, {pipeline_mode = #tpu.pipeline_mode<synchronous>, transform_indices = @transform_1, window_bounds = array<i64: 16, 1>}, {pipeline_mode = #tpu.pipeline_mode<synchronous>, transform_indices = @transform_2, window_bounds = array<i64: 16, 2>}, {pipeline_mode = #tpu.pipeline_mode<synchronous>, transform_indices = @transform_3, window_bounds = array<i64: 2, 1>}, {transform_indices = @transform_4, window_bounds = array<i64: 4, 128>}, {transform_indices = @transform_5, window_bounds = array<i64: 2, 128>}]} {
    %c0 = arith.constant 0 : index
    %c0_0 = arith.constant 0 : index
    %0 = vector.load %arg5[%c0, %c0_0] : memref<4x128xf32, #tpu.memory_space<vmem>>, vector<4x128xf32>
    %c0_1 = arith.constant 0 : index
    %c0_2 = arith.constant 0 : index
    %1 = vector.load %arg1[%c0_1, %c0_2] : memref<16x4xf32, #tpu.memory_space<vmem>>, vector<16x4xf32>
    %c0_3 = arith.constant 0 : index
    %c0_4 = arith.constant 0 : index
    %2 = vector.load %arg3[%c0_3, %c0_4] : memref<16x2xf32, #tpu.memory_space<vmem>>, vector<16x2xf32>
    %c0_5 = arith.constant 0 : index
    %c0_6 = arith.constant 0 : index
    %3 = vector.load %arg4[%c0_5, %c0_6] : memref<2x1xf32, #tpu.memory_space<vmem>>, vector<2x1xf32>
    %4 = vector.extract_strided_slice %1 {offsets = [0, 0], sizes = [16, 1], strides = [1, 1]} : vector<16x4xf32> to vector<16x1xf32>
    %5 = vector.extract_strided_slice %0 {offsets = [0, 0], sizes = [1, 128], strides = [1, 1]} : vector<4x128xf32> to vector<1x128xf32>
    %6 = vector.broadcast %4 : vector<16x1xf32> to vector<16x128xf32>
    %7 = vector.broadcast %5 : vector<1x128xf32> to vector<16x128xf32>
    %8 = arith.mulf %6, %7 : vector<16x128xf32>
    %9 = vector.extract_strided_slice %1 {offsets = [0, 1], sizes = [16, 1], strides = [1, 1]} : vector<16x4xf32> to vector<16x1xf32>
    %10 = vector.extract_strided_slice %0 {offsets = [1, 0], sizes = [1, 128], strides = [1, 1]} : vector<4x128xf32> to vector<1x128xf32>
    %11 = vector.broadcast %9 : vector<16x1xf32> to vector<16x128xf32>
    %12 = vector.broadcast %10 : vector<1x128xf32> to vector<16x128xf32>
    %13 = arith.mulf %11, %12 : vector<16x128xf32>
    %14 = arith.addf %8, %13 : vector<16x128xf32>
    %15 = vector.extract_strided_slice %1 {offsets = [0, 2], sizes = [16, 1], strides = [1, 1]} : vector<16x4xf32> to vector<16x1xf32>
    %16 = vector.extract_strided_slice %0 {offsets = [2, 0], sizes = [1, 128], strides = [1, 1]} : vector<4x128xf32> to vector<1x128xf32>
    %17 = vector.broadcast %15 : vector<16x1xf32> to vector<16x128xf32>
    %18 = vector.broadcast %16 : vector<1x128xf32> to vector<16x128xf32>
    %19 = arith.mulf %17, %18 : vector<16x128xf32>
    %20 = arith.addf %14, %19 : vector<16x128xf32>
    %21 = vector.extract_strided_slice %1 {offsets = [0, 3], sizes = [16, 1], strides = [1, 1]} : vector<16x4xf32> to vector<16x1xf32>
    %22 = vector.extract_strided_slice %0 {offsets = [3, 0], sizes = [1, 128], strides = [1, 1]} : vector<4x128xf32> to vector<1x128xf32>
    %23 = vector.broadcast %21 : vector<16x1xf32> to vector<16x128xf32>
    %24 = vector.broadcast %22 : vector<1x128xf32> to vector<16x128xf32>
    %25 = arith.mulf %23, %24 : vector<16x128xf32>
    %26 = arith.addf %20, %25 : vector<16x128xf32>
    %c0_7 = arith.constant 0 : index
    %c0_8 = arith.constant 0 : index
    %27 = vector.load %arg2[%c0_7, %c0_8] : memref<16x1xf32, #tpu.memory_space<vmem>>, vector<16x1xf32>
    %28 = vector.broadcast %27 : vector<16x1xf32> to vector<16x128xf32>
    %29 = arith.addf %26, %28 : vector<16x128xf32>
    %cst = arith.constant 0.000000e+00 : f32
    %30 = vector.broadcast %cst : f32 to vector<16x128xf32>
    %31 = arith.maximumf %29, %30 : vector<16x128xf32>
    %32 = vector.extract_strided_slice %2 {offsets = [0, 0], sizes = [16, 1], strides = [1, 1]} : vector<16x2xf32> to vector<16x1xf32>
    %33 = vector.broadcast %32 : vector<16x1xf32> to vector<16x128xf32>
    %34 = arith.mulf %33, %31 : vector<16x128xf32>
    %cst_9 = arith.constant dense<0.000000e+00> : vector<128xf32>
    %35 = vector.multi_reduction <add>, %34, %cst_9 [0] : vector<16x128xf32> to vector<128xf32>
    %36 = vector.shape_cast %35 : vector<128xf32> to vector<1x128xf32>
    %37 = vector.extract_strided_slice %3 {offsets = [0, 0], sizes = [1, 1], strides = [1, 1]} : vector<2x1xf32> to vector<1x1xf32>
    %38 = vector.broadcast %37 : vector<1x1xf32> to vector<1x128xf32>
    %39 = arith.addf %36, %38 : vector<1x128xf32>
    %c0_10 = arith.constant 0 : index
    %c0_11 = arith.constant 0 : index
    %40 = vector.load %arg6[%c0_10, %c0_11] : memref<2x128xf32, #tpu.memory_space<vmem>>, vector<1x128xf32>
    tpu.vector_store %arg6[%c0_10, %c0_11], %39 {strides = array<i32>} : memref<2x128xf32, #tpu.memory_space<vmem>>, vector<1x128xf32>,
    %41 = vector.extract_strided_slice %2 {offsets = [0, 1], sizes = [16, 1], strides = [1, 1]} : vector<16x2xf32> to vector<16x1xf32>
    %42 = vector.broadcast %41 : vector<16x1xf32> to vector<16x128xf32>
    %43 = arith.mulf %42, %31 : vector<16x128xf32>
    %cst_12 = arith.constant dense<0.000000e+00> : vector<128xf32>
    %44 = vector.multi_reduction <add>, %43, %cst_12 [0] : vector<16x128xf32> to vector<128xf32>
    %45 = vector.shape_cast %44 : vector<128xf32> to vector<1x128xf32>
    %46 = vector.extract_strided_slice %3 {offsets = [1, 0], sizes = [1, 1], strides = [1, 1]} : vector<2x1xf32> to vector<1x1xf32>
    %47 = vector.broadcast %46 : vector<1x1xf32> to vector<1x128xf32>
    %48 = arith.addf %45, %47 : vector<1x128xf32>
    %c1 = arith.constant 1 : index
    %c0_13 = arith.constant 0 : index
    %49 = vector.load %arg6[%c1, %c0_13] : memref<2x128xf32, #tpu.memory_space<vmem>>, vector<1x128xf32>
    tpu.vector_store %arg6[%c1, %c0_13], %48 {strides = array<i32>} : memref<2x128xf32, #tpu.memory_space<vmem>>, vector<1x128xf32>,
    return
  }
  func.func @transform_0(%arg0: i32) -> (i32, i32) {
    %c0_i32 = arith.constant 0 : i32
    %c0_i32_0 = arith.constant 0 : i32
    %c0_i32_1 = arith.constant 0 : i32
    return %c0_i32, %c0_i32_0 : i32, i32
  }
  func.func @transform_1(%arg0: i32) -> (i32, i32) {
    %c0_i32 = arith.constant 0 : i32
    %c0_i32_0 = arith.constant 0 : i32
    %c0_i32_1 = arith.constant 0 : i32
    return %c0_i32, %c0_i32_0 : i32, i32
  }
  func.func @transform_2(%arg0: i32) -> (i32, i32) {
    %c0_i32 = arith.constant 0 : i32
    %c0_i32_0 = arith.constant 0 : i32
    %c0_i32_1 = arith.constant 0 : i32
    return %c0_i32, %c0_i32_0 : i32, i32
  }
  func.func @transform_3(%arg0: i32) -> (i32, i32) {
    %c0_i32 = arith.constant 0 : i32
    %c0_i32_0 = arith.constant 0 : i32
    %c0_i32_1 = arith.constant 0 : i32
    return %c0_i32, %c0_i32_0 : i32, i32
  }
  func.func @transform_4(%arg0: i32) -> (i32, i32) {
    %c0_i32 = arith.constant 0 : i32
    %c0_i32_0 = arith.constant 0 : i32
    return %c0_i32, %arg0 : i32, i32
  }
  func.func @transform_5(%arg0: i32) -> (i32, i32) {
    %c0_i32 = arith.constant 0 : i32
    %c0_i32_0 = arith.constant 0 : i32
    return %c0_i32, %arg0 : i32, i32
  }
}

</mosaic_0001>

<bundles_post_ra>
// kernel: tpu_custom_call.1
= control target key start
LH: loop header
LB: loop body
LE: loop exit
PB: predicated region body
PF: predicated region fallthrough
CT: control target
= control target key end

     0   :  { %v199_v1 = vmov 1   ;;  %v200_v2 = vmov 0   ;;  %s261_s0 = inlined_call_operand.vmem [shape: f32[16,4], index: 0, kind: input, shape index: {}]   ;;  %s262_s1 = inlined_call_operand.vmem [shape: f32[16,1], index: 1, kind: input, shape index: {}]   ;;  %s263_s2 = inlined_call_operand.vmem [shape: f32[16,2], index: 2, kind: input, shape index: {}]   ;;  %s264_s3 = inlined_call_operand.vmem [shape: f32[2,1], index: 3, kind: input, shape index: {}]   ;;  %s265_s4 = inlined_call_operand.vmem [shape: f32[4,128], index: 4, kind: input, shape index: {}]   ;;  %s266_s5 = inlined_call_operand.hbm [shape: f32[2,128], index: 5, kind: output, shape index: {}]  }
   0x1   :  { %v22_v0 = vld [vmem:[%s261_s0] sm:$0xff]  ;;  %162 = vset.pattern.permute.xlu1 %v199_v1  ;;  %161 = vset.pattern.permute.xlu0 %v200_v2 }
   0x2   :  { %41 = vperm.xlu1 %162, %v22_v0   ;;  %29 = vperm.xlu0 %161, %v22_v0  }
   0x3   :  { %10 = vsyncpa [#allocation3], 0  ;;  %v201_v3 = vmov 2   ;;  %v23_v4 = vld [vmem:[%s261_s0 + $0x8] sm:$0xff]  ;;  %v202_v5 = vmov 3   ;;  %v79_v6 = vld [vmem:[%s262_s1] sm:$0xff] }
   0x4   :  { %163 = vset.pattern.permute.xlu2 %v201_v3  ;;  %v80_v7 = vld [vmem:[%s262_s1 + $0x8] sm:$0xff]  ;;  %v24_v9 = vld [vmem:[%s263_s2] sm:$0xff]  ;;  %s147_s8 = sshll.u32 %s266_s5, 4  ;;  %s148_s8 = int_to_ptr.hbm [resolvable:$true] %s147_s8 }
   0x5   :  { %54 = vperm.xlu2 %163, %v22_v0   ;;  %v25_v8 = vld [vmem:[%s263_s2 + $0x8] sm:$0xff]  ;;  %v26_v10 = vld [vmem:[%s264_s3] sm:$0x3]  ;;  %s203_s2 = smov [#allocation2]  }
   0x6   :  { %v21_v14 = vld [vmem:[%s265_s4] sm:$0xf]  ;;  %s145_s3 = sshll.u32 %s203_s2, 4  ;;  %s146_s3 = int_to_ptr.vmem [resolvable:$true] %s145_s3 }
   0x7   :  { %v48_v16 = vperm.slane %v21_v14, 1  ;;  %v37_v17 = vperm.slane %v21_v14, 0  ;;  %v61_v20 = vperm.slane %v21_v14, 2  ;;  %v74_v25 = vperm.slane %v21_v14, 3 }
   0xa   :  { %45 = vperm.xlu1 %162, %v23_v4   ;;  %34 = vperm.xlu0 %161, %v23_v4  }
   0xd   :  { %58 = vperm.xlu2 %163, %v23_v4  }
  0x12   :  { %165 = vset.pattern.permute.xlu1 %v202_v5  ;;  %164 = vset.pattern.permute.xlu0 %v202_v5 }
  0x13   :  { %71 = vperm.xlu1 %165, %v23_v4   ;;  %67 = vperm.xlu0 %164, %v22_v0  }
  0x15   :  { %166 = vset.pattern.permute.xlu2 %v200_v2 }
  0x16   :  { %83 = vperm.xlu2 %166, %v79_v6  }
  0x1b   :  { %167 = vset.pattern.permute.xlu1 %v200_v2  ;;  %168 = vset.pattern.permute.xlu0 %v200_v2 }
  0x1c   :  { %88 = vperm.xlu1 %167, %v80_v7   ;;  %102 = vperm.xlu0 %168, %v25_v8  }
  0x1e   :  { %97 = vperm.xlu2 %166, %v24_v9  }
  0x24   :  { %169 = vset.pattern.permute.xlu1 %v199_v1  ;;  %172 = vset.pattern.permute.xlu0 %v199_v1 }
  0x25   :  { %122 = vperm.xlu1 %169, %v24_v9  }
  0x26   :  { %170 = vset.pattern.permute.xlu2 %v199_v1 }
  0x27   :  { %126 = vperm.xlu2 %170, %v25_v8  }
  0x2d   :  { %171 = vset.pattern.permute.xlu1 %v200_v2 }
  0x2e   :  { %116 = vperm.xlu1 %171, %v26_v10  }
  0x5f   :  { %v55_v11 = vpop.permute.xlu2 %54 }
  0x60   :  { %v62_v23 = vmul.f32 %v61_v20, %v55_v11 }
  0x67   :  { %v59_v15 = vpop.permute.xlu2 %58 }
  0x68   :  { %v63_v35 = vmul.f32 %v61_v20, %v59_v15 }
  0x70   :  { %v84_v28 = vpop.permute.xlu2 %83 }
  0x74   :  { %v42_v12 = vpop.permute.xlu1 %41  ;;  %v30_v13 = vpop.permute.xlu0 %29 }
  0x75   :  { %v49_v21 = vmul.f32 %v48_v16, %v42_v12  ;;  %v38_v22 = vmul.f32 %v37_v17, %v30_v13 }
  0x77   :  { %v51_v24 = vadd.f32 %v49_v21, %v38_v22 }
  0x78   :  { %v98_v39 = vpop.permute.xlu2 %97 }
  0x79   :  { %v64_v31 = vadd.f32 %v62_v23, %v51_v24 }
  0x7c   :  { %v46_v18 = vpop.permute.xlu1 %45  ;;  %v35_v19 = vpop.permute.xlu0 %34 }
  0x7d   :  { %v50_v26 = vmul.f32 %v48_v16, %v46_v18  ;;  %v39_v27 = vmul.f32 %v37_v17, %v35_v19 }
  0x7f   :  { %v52_v33 = vadd.f32 %v50_v26, %v39_v27 }
  0x81   :  { %v65_v38 = vadd.f32 %v63_v35, %v52_v33  ;;  %v127_v48 = vpop.permute.xlu2 %126 }
  0x85   :  { %v72_v29 = vpop.permute.xlu1 %71  ;;  %v68_v30 = vpop.permute.xlu0 %67 }
  0x86   :  { %v75_v32 = vmul.f32 %v74_v25, %v68_v30  ;;  %v76_v36 = vmul.f32 %v74_v25, %v72_v29 }
  0x88   :  { %v77_v34 = vadd.f32 %v75_v32, %v64_v31  ;;  %v78_v40 = vadd.f32 %v76_v36, %v65_v38 }
  0x8a   :  { %v91_v37 = vadd.f32 %v84_v28, %v77_v34 }
  0x8c   :  { %v93_v42 = vmax.f32 %v91_v37, 0.0 }
  0x8e   :  { %v89_v41 = vpop.permute.xlu1 %88  ;;  %v103_v44 = vpop.permute.xlu0 %102  ;;  %v105_v46 = vmul.f32 %v98_v39, %v93_v42 }
  0x8f   :  { %v92_v43 = vadd.f32 %v89_v41, %v78_v40 }
  0x91   :  { %v94_v45 = vmax.f32 %v92_v43, 0.0 }
  0x93   :  { %v106_v47 = vmul.f32 %v103_v44, %v94_v45  ;;  %v130_v52 = vmul.f32 %v127_v48, %v94_v45 }
  0x95   :  { %v107_v49 = vadd.f32 %v106_v47, %v105_v46 }
  0x97   :  { %v108_v50 = vrot.slane %v107_v49, 4  ;;  %v123_v51 = vpop.permute.xlu1 %122 }
  0x98   :  { %v129_v53 = vmul.f32 %v123_v51, %v93_v42 }
  0x99   :  { %v109_v54 = vadd.f32 %v108_v50, %v107_v49 }
  0x9a   :  { %v131_v55 = vadd.f32 %v130_v52, %v129_v53 }
  0x9b   :  { %v110_v56 = vrot.slane %v109_v54, 2 }
  0x9c   :  { %v132_v57 = vrot.slane %v131_v55, 4 }
  0x9d   :  { %v111_v58 = vadd.f32 %v110_v56, %v109_v54 }
  0x9e   :  { %v133_v59 = vadd.f32 %v132_v57, %v131_v55 }
  0x9f   :  { %v112_v60 = vrot.slane %v111_v58, 1 }
  0xa0   :  { %v117_v61 = vpop.permute.xlu1 %116  ;;  %v134_v62 = vrot.slane %v133_v59, 2 }
  0xa1   :  { %v113_v63 = vadd.f32 %v112_v60, %v111_v58 }
  0xa2   :  { %v135_v0 = vadd.f32 %v134_v62, %v133_v59 }
  0xa3   :  { %v119_v1 = vadd.f32 %v117_v61, %v113_v63 }
  0xa4   :  { %v136_v2 = vrot.slane %v135_v0, 1 }
  0xa5   :  { %120 = vst [vmem:[#allocation2] sm:$0x1] %v119_v1 }
  0xa6   :  { %v137_v3 = vadd.f32 %v136_v2, %v135_v0 }
  0xa8   :  { %v138_v4 = vadd.f32 %v137_v3, %v117_v61 }
  0xaa   :  { %139 = vst [vmem:[#allocation2] sm:$0x2] %v138_v4 }
  0xab   :  { %150 = dma.vmem_to_hbm [thread:$0]  %s146_s3, 32, %s148_s8, [#allocation3]  }
  0xac   :  { %197 = dma.done.wait [#allocation3], 32  }
  0xad   :  { %198 = vsyncadd [#allocation3], 4294967264 }
  0xae   :  { %155 = vsyncpa [#allocation3], 1 }

</bundles_post_ra>
